<compile_context>
chip_gen: v5e
topology: v5e:2x2
jax: 0.10.0
libtpu: 0.0.40
codegen_flags: <defaults>
</compile_context>

<pallas_src>
import jax
import jax.numpy as jnp
from jax.experimental import pallas as pl
from jax.experimental.pallas import tpu as pltpu


# ---------------------------------------------------------------------------
# Transposed-conv (k=4, s=2, p=1) tap bookkeeping.
# For output parity a (row) / b (col):  padded-window offset d -> kernel tap k.
# ---------------------------------------------------------------------------
_TAP = {0: {1: 1, 0: 3}, 1: {2: 0, 1: 2}}          # parity -> {offset: tap}
_WINDOWS = [(dy, dx) for dy in range(3) for dx in range(3)]   # 9 shifted windows


def _build_weight_matrix(w_pt, cin, cout):
    """Parity-stacked, window-major weight matrix (4*Cout, 9*Cin)."""
    row_blocks = []
    for a in (0, 1):
        for b in (0, 1):                            # parity p = 2a + b
            cols = []
            for (dy, dx) in _WINDOWS:
                if dy in _TAP[a] and dx in _TAP[b]:
                    ky, kx = _TAP[a][dy], _TAP[b][dx]
                    cols.append(w_pt[:, :, ky, kx].T)            # (Cout, Cin)
                else:
                    cols.append(jnp.zeros((cout, cin), w_pt.dtype))
            row_blocks.append(jnp.concatenate(cols, axis=1))     # (Cout, 9*Cin)
    return jnp.concatenate(row_blocks, axis=0)                   # (4*Cout, 9*Cin)


# ---------------------------------------------------------------------------
# Pallas kernel: fused matmul + train-mode BatchNorm + LeakyReLU
# Layout: channels (x parity) on sublanes, M = N*H*W on lanes.
# ---------------------------------------------------------------------------
def _dcgan_upconv_kernel(p_ref, w_ref, g_ref, b_ref, o_ref):
    # p_ref : (Kp, M)       bf16  im2col patches (window-major, zero-padded K)
    # w_ref : (4*Cout, Kp)  bf16  parity-stacked weights
    # g_ref : (Cout, 1)     f32   BN gamma
    # b_ref : (Cout, 1)     f32   BN beta
    # o_ref : (4*Cout, M)   f32   parity-stacked output
    cout = g_ref.shape[0]
    m = p_ref.shape[1]

    # Single fused MXU matmul, f32 accumulation.
    acc = jnp.dot(w_ref[...], p_ref[...],
                  preferred_element_type=jnp.float32)            # (4*Cout, M)

    # BatchNorm (training mode): biased mean/var per output channel over all
    # N*Hout*Wout positions (= all 4 parity row-blocks x all M lanes).
    row_s = acc.sum(axis=-1, keepdims=True)                      # (4*Cout, 1)
    row_ss = (acc * acc).sum(axis=-1, keepdims=True)             # (4*Cout, 1)

    ch_s = (row_s[0:cout] + row_s[cout:2 * cout]
            + row_s[2 * cout:3 * cout] + row_s[3 * cout:4 * cout])
    ch_ss = (row_ss[0:cout] + row_ss[cout:2 * cout]
             + row_ss[2 * cout:3 * cout] + row_ss[3 * cout:4 * cout])

    count = jnp.float32(4 * m)
    mean = ch_s / count                                          # (Cout, 1)
    var = jnp.maximum(ch_ss / count - mean * mean, 0.0)          # clamp >= 0
    inv = jax.lax.rsqrt(var + jnp.float32(1e-5))
    scale = g_ref[...] * inv                                     # (Cout, 1)
    shift = b_ref[...] - mean * scale                            # (Cout, 1)

    scale4 = jnp.concatenate([scale, scale, scale, scale], axis=0)  # (4*Cout,1)
    shift4 = jnp.concatenate([shift, shift, shift, shift], axis=0)

    y = acc * scale4 + shift4
    o_ref[...] = jnp.where(y > 0, y, jnp.float32(0.2) * y)       # LeakyReLU(0.2)


# ---------------------------------------------------------------------------
# Wrapper: im2col glue -> pallas_call -> parity interleave glue
# ---------------------------------------------------------------------------
def dcgan_upconv_forward(x_nchw, w_pt, conv_bias, beta_gamma=None,
                         *unused, gamma=None, beta=None):
    raise NotImplementedError  # placeholder to avoid accidental misuse


def dcgan_upconv(x_nchw, w_pt, conv_bias, gamma, beta):
    """x_nchw: (N, Cin, H, W); w_pt: (Cin, Cout, 4, 4) (PyTorch layout).

    conv_bias is accepted for API parity but not used inside the kernel: a
    per-channel constant is exactly cancelled by training-mode BatchNorm.
    """
    del conv_bias
    n, cin, h, w = x_nchw.shape
    cout = w_pt.shape[1]
    m = n * h * w

    # ---- glue: padded channel-major input, 9 shifted windows, M on lanes ----
    xc = jnp.transpose(x_nchw, (1, 0, 2, 3))                 # (Cin, N, H, W)
    xp = jnp.pad(xc, ((0, 0), (0, 0), (1, 1), (1, 1)))       # (Cin, N, H+2, W+2)
    wins = [xp[:, :, dy:dy + h, dx:dx + w].reshape(cin, m)
            for (dy, dx) in _WINDOWS]
    pmat = jnp.concatenate(wins, axis=0)                     # (9*Cin, M)
    wmat = _build_weight_matrix(w_pt.astype(jnp.float32), cin, cout)

    # Zero-pad the contraction dim to a bf16-sublane-friendly multiple of 16.
    k = 9 * cin
    kp = ((k + 15) // 16) * 16
    if kp != k:
        pmat = jnp.pad(pmat, ((0, kp - k), (0, 0)))
        wmat = jnp.pad(wmat, ((0, 0), (0, kp - k)))

    pmat = pmat.astype(jnp.bfloat16)                         # (Kp, M)
    wmat = wmat.astype(jnp.bfloat16)                         # (4*Cout, Kp)
    g = gamma.reshape(cout, 1).astype(jnp.float32)
    bt = beta.reshape(cout, 1).astype(jnp.float32)

    # ---- hot path: single Pallas kernel invocation --------------------------
    out_k = pl.pallas_call(
        _dcgan_upconv_kernel,
        out_shape=jax.ShapeDtypeStruct((4 * cout, m), jnp.float32),
        in_specs=[pl.BlockSpec(memory_space=pltpu.MemorySpace.VMEM)] * 4,
        out_specs=pl.BlockSpec(memory_space=pltpu.MemorySpace.VMEM),
    )(pmat, wmat, g, bt)

    # ---- glue: interleave parities back into (N, Cout, 2H, 2W) --------------
    arr = out_k.reshape(2, 2, cout, n, h, w)        # [a, b, c, n, i, j]
    arr = arr.transpose(3, 2, 4, 0, 5, 1)           # [n, c, i, a, j, b]
    return arr.reshape(n, cout, 2 * h, 2 * w)       # out[n,c,2i+a,2j+b]


# ---------------------------------------------------------------------------
# Pure-JAX reference (transposed conv via lhs-dilated conv + BN + LeakyReLU)
# ---------------------------------------------------------------------------
def reference_forward(x_nchw, w_pt, conv_bias, gamma, beta):
    w_conv = jnp.transpose(jnp.flip(w_pt, axis=(2, 3)), (1, 0, 2, 3))  # OIHW
    y = jax.lax.conv_general_dilated(
        x_nchw, w_conv, window_strides=(1, 1), padding=[(2, 2), (2, 2)],
        lhs_dilation=(2, 2), dimension_numbers=("NCHW", "OIHW", "NCHW"),
        precision=jax.lax.Precision.HIGHEST)
    y = y + conv_bias.reshape(1, -1, 1, 1)
    mean = y.mean(axis=(0, 2, 3), keepdims=True)
    var = y.var(axis=(0, 2, 3), keepdims=True)          # biased, as PyTorch BN
    yn = (y - mean) * jax.lax.rsqrt(var + 1e-5)
    yn = yn * gamma.reshape(1, -1, 1, 1) + beta.reshape(1, -1, 1, 1)
    return jnp.where(yn > 0, yn, 0.2 * yn)


if __name__ == "__main__":
    N, NIN, NOUT, H, W = 2, 4, 8, 16, 16

    key = jax.random.PRNGKey(0)
    kx, kw, kb, kg, kbeta = jax.random.split(key, 5)

    x = jax.random.normal(kx, (N, NIN, H, W), dtype=jnp.float32)

    # Deterministic parameter init (PyTorch-like uniform bounds for the conv).
    bound = 1.0 / jnp.sqrt(jnp.float32(NIN * 4 * 4))
    w_pt = jax.random.uniform(kw, (NIN, NOUT, 4, 4), jnp.float32, -bound, bound)
    conv_bias = jax.random.uniform(kb, (NOUT,), jnp.float32, -bound, bound)
    gamma = 1.0 + 0.1 * jax.random.normal(kg, (NOUT,), jnp.float32)
    beta = 0.1 * jax.random.normal(kbeta, (NOUT,), jnp.float32)

    out = dcgan_upconv(x, w_pt, conv_bias, gamma, beta)
    out = jax.block_until_ready(out)

    assert out.shape == (N, NOUT, 2 * H, 2 * W), out.shape

    ref = jax.block_until_ready(reference_forward(x, w_pt, conv_bias, gamma, beta))
    # Tolerance accounts for bf16 MXU operands (f32 accumulation + BN renorm).
    assert jnp.allclose(out, ref, atol=2e-2, rtol=2e-2), float(
        jnp.max(jnp.abs(out - ref)))

    print("KERNEL_OK")
</pallas_src>

<mosaic_0001>
module attributes {stable_mosaic.version = 11 : i64} {
  func.func @_dcgan_upconv_kernel(%arg0: memref<48x512xbf16, #tpu.memory_space<vmem>>, %arg1: memref<32x48xbf16, #tpu.memory_space<vmem>>, %arg2: memref<8x1xf32, #tpu.memory_space<vmem>>, %arg3: memref<8x1xf32, #tpu.memory_space<vmem>>, %arg4: memref<32x512xf32, #tpu.memory_space<vmem>>) attributes {dimension_semantics = [], scalar_prefetch = 0 : i64, scratch_operands = 0 : i64, tpu.core_type = #tpu.core_type<tc>} {
    %c0 = arith.constant 0 : index
    %c0_0 = arith.constant 0 : index
    %0 = vector.load %arg1[%c0, %c0_0] : memref<32x48xbf16, #tpu.memory_space<vmem>>, vector<32x48xbf16>
    %c0_1 = arith.constant 0 : index
    %c0_2 = arith.constant 0 : index
    %1 = vector.load %arg0[%c0_1, %c0_2] : memref<48x512xbf16, #tpu.memory_space<vmem>>, vector<48x512xbf16>
    %cst = arith.constant dense<0.000000e+00> : vector<32x512xf32>
    %2 = tpu.matmul %0, %1, %cst {dimension_numbers = #tpu.dot_dimension_numbers<[1], [0], [0], [1], [0, 0, 1, 1], [], []>} : vector<32x48xbf16>, vector<48x512xbf16>, vector<32x512xf32> -> vector<32x512xf32>
    %cst_3 = arith.constant dense<0.000000e+00> : vector<32xf32>
    %3 = vector.multi_reduction <add>, %2, %cst_3 [1] : vector<32x512xf32> to vector<32xf32>
    %4 = vector.shape_cast %3 : vector<32xf32> to vector<32x1xf32>
    %5 = arith.mulf %2, %2 : vector<32x512xf32>
    %cst_4 = arith.constant dense<0.000000e+00> : vector<32xf32>
    %6 = vector.multi_reduction <add>, %5, %cst_4 [1] : vector<32x512xf32> to vector<32xf32>
    %7 = vector.shape_cast %6 : vector<32xf32> to vector<32x1xf32>
    %8 = vector.extract_strided_slice %4 {offsets = [0, 0], sizes = [8, 1], strides = [1, 1]} : vector<32x1xf32> to vector<8x1xf32>
    %9 = vector.extract_strided_slice %4 {offsets = [8, 0], sizes = [8, 1], strides = [1, 1]} : vector<32x1xf32> to vector<8x1xf32>
    %10 = arith.addf %8, %9 : vector<8x1xf32>
    %11 = vector.extract_strided_slice %4 {offsets = [16, 0], sizes = [8, 1], strides = [1, 1]} : vector<32x1xf32> to vector<8x1xf32>
    %12 = arith.addf %10, %11 : vector<8x1xf32>
    %13 = vector.extract_strided_slice %4 {offsets = [24, 0], sizes = [8, 1], strides = [1, 1]} : vector<32x1xf32> to vector<8x1xf32>
    %14 = arith.addf %12, %13 : vector<8x1xf32>
    %15 = vector.extract_strided_slice %7 {offsets = [0, 0], sizes = [8, 1], strides = [1, 1]} : vector<32x1xf32> to vector<8x1xf32>
    %16 = vector.extract_strided_slice %7 {offsets = [8, 0], sizes = [8, 1], strides = [1, 1]} : vector<32x1xf32> to vector<8x1xf32>
    %17 = arith.addf %15, %16 : vector<8x1xf32>
    %18 = vector.extract_strided_slice %7 {offsets = [16, 0], sizes = [8, 1], strides = [1, 1]} : vector<32x1xf32> to vector<8x1xf32>
    %19 = arith.addf %17, %18 : vector<8x1xf32>
    %20 = vector.extract_strided_slice %7 {offsets = [24, 0], sizes = [8, 1], strides = [1, 1]} : vector<32x1xf32> to vector<8x1xf32>
    %21 = arith.addf %19, %20 : vector<8x1xf32>
    %cst_5 = arith.constant 2.048000e+03 : f32
    %22 = vector.broadcast %cst_5 : f32 to vector<8x1xf32>
    %23 = arith.divf %14, %22 : vector<8x1xf32>
    %cst_6 = arith.constant 2.048000e+03 : f32
    %24 = vector.broadcast %cst_6 : f32 to vector<8x1xf32>
    %25 = arith.divf %21, %24 : vector<8x1xf32>
    %26 = arith.mulf %23, %23 : vector<8x1xf32>
    %27 = arith.subf %25, %26 : vector<8x1xf32>
    %cst_7 = arith.constant 0.000000e+00 : f32
    %28 = vector.broadcast %cst_7 : f32 to vector<8x1xf32>
    %29 = arith.maximumf %27, %28 : vector<8x1xf32>
    %cst_8 = arith.constant 9.99999974E-6 : f32
    %30 = vector.broadcast %cst_8 : f32 to vector<8x1xf32>
    %31 = arith.addf %29, %30 : vector<8x1xf32>
    %32 = math.rsqrt %31 : vector<8x1xf32>
    %c0_9 = arith.constant 0 : index
    %c0_10 = arith.constant 0 : index
    %33 = vector.load %arg2[%c0_9, %c0_10] : memref<8x1xf32, #tpu.memory_space<vmem>>, vector<8x1xf32>
    %34 = arith.mulf %33, %32 : vector<8x1xf32>
    %c0_11 = arith.constant 0 : index
    %c0_12 = arith.constant 0 : index
    %35 = vector.load %arg3[%c0_11, %c0_12] : memref<8x1xf32, #tpu.memory_space<vmem>>, vector<8x1xf32>
    %36 = arith.mulf %23, %34 : vector<8x1xf32>
    %37 = arith.subf %35, %36 : vector<8x1xf32>
    %38 = tpu.concatenate %34, %34, %34, %34 in 0 : vector<8x1xf32>, vector<8x1xf32>, vector<8x1xf32>, vector<8x1xf32> -> vector<32x1xf32>
    %39 = tpu.concatenate %37, %37, %37, %37 in 0 : vector<8x1xf32>, vector<8x1xf32>, vector<8x1xf32>, vector<8x1xf32> -> vector<32x1xf32>
    %40 = vector.broadcast %38 : vector<32x1xf32> to vector<32x512xf32>
    %41 = arith.mulf %2, %40 : vector<32x512xf32>
    %42 = vector.broadcast %39 : vector<32x1xf32> to vector<32x512xf32>
    %43 = arith.addf %41, %42 : vector<32x512xf32>
    %cst_13 = arith.constant 0.000000e+00 : f32
    %44 = vector.broadcast %cst_13 : f32 to vector<32x512xf32>
    %45 = arith.cmpf ogt, %43, %44 : vector<32x512xf32>
    %cst_14 = arith.constant 2.000000e-01 : f32
    %46 = vector.broadcast %cst_14 : f32 to vector<32x512xf32>
    %47 = arith.mulf %46, %43 : vector<32x512xf32>
    %48 = arith.select %45, %43, %47 : vector<32x512xi1>, vector<32x512xf32>
    %c0_15 = arith.constant 0 : index
    %c0_16 = arith.constant 0 : index
    %49 = vector.load %arg4[%c0_15, %c0_16] : memref<32x512xf32, #tpu.memory_space<vmem>>, vector<32x512xf32>
    tpu.vector_store %arg4[%c0_15, %c0_16], %48 {strides = array<i32>} : memref<32x512xf32, #tpu.memory_space<vmem>>, vector<32x512xf32>,
    return
  }
}

</mosaic_0001>

<bundles_post_ra>
// kernel: tpu_custom_call.1
= control target key start
LH: loop header
LB: loop body
LE: loop exit
PB: predicated region body
PF: predicated region fallthrough
CT: control target
= control target key end

     0   :  { %9 = vsyncpa [#allocation3], 0  ;;  %s733_s0 = inlined_call_operand.hbm [shape: bf16[48,512], index: 0, kind: input, shape index: {}]   ;;  %s734_s1 = inlined_call_operand.vmem [shape: bf16[32,48], index: 1, kind: input, shape index: {}]   ;;  %s735_s2 = inlined_call_operand.vmem [shape: f32[8,1], index: 2, kind: input, shape index: {}]   ;;  %s736_s3 = inlined_call_operand.vmem [shape: f32[8,1], index: 3, kind: input, shape index: {}]   ;;  %s737_s4 = inlined_call_operand.hbm [shape: f32[32,512], index: 4, kind: output, shape index: {}]  }
   0x1   :  { %10 = vsyncpa [#allocation4], 0  ;;  %s15_s17 = sshll.u32 %s733_s0, 4  ;;  %s563_s18 = smov [#allocation2]   ;;  %s16_s17 = int_to_ptr.hbm [resolvable:$true] %s15_s17 }
   0x2   :  { %s17_s19 = sshll.u32 %s563_s18, 4  ;;  %s564_s20 = smov 256   ;;  %s18_s19 = int_to_ptr.vmem [resolvable:$true] %s17_s19 }
   0x3   :  { %s565_s21 = smov 16  }
   0x4   :  { %23 = dma.hbm_to_vmem [thread:$0]  %s16_s17, 1536, %s18_s19, [#allocation3], %s564_s20, %s564_s20, %s565_s21  }
   0x5   :  { %559 = dma.done.wait [#allocation3], 1536  }
   0x6   :  { %560 = vsyncadd [#allocation3], 4294965760  ;;  %v461_v0 = vld [vmem:[#allocation2 + $0x40] sm:$0xf]  ;;  %v495_v1 = vld [vmem:[#allocation2 + $0x4c] sm:$0xf0] }
   0x7   :  { %v493_v2 = vld [vmem:[#allocation2 + $0x44] sm:$0xf]  ;;  %v462_v3 = vor.u32 %v495_v1, %v461_v0  ;;  %v463_v4 = vld [vmem:[#allocation2 + $0x50] sm:$0xf0]  ;;  %v469_v5 = vld [vmem:[#allocation2 + $0x48] sm:$0xf] }
   0x8   :  { %v496_v6 = vld [vmem:[#allocation2 + $0x54] sm:$0xf0]  ;;  %v466_v7 = vor.u32 %v493_v2, %v463_v4  ;;  %v494_v9 = vld [vmem:[#allocation2 + $0x4c] sm:$0xf]  ;;  %v471_v10 = vld [vmem:[#allocation2 + $0x58] sm:$0xf0] }
   0x9   :  { %v470_v8 = vor.u32 %v496_v6, %v469_v5  ;;  %v445_v11 = vld [vmem:[#allocation2 + $0x20] sm:$0xf]  ;;  %133 = vmatpush.bf16.msra.mxu0 %v462_v3  ;;  %v474_v12 = vor.u32 %v494_v9, %v471_v10  ;;  %v491_v13 = vld [vmem:[#allocation2 + $0x2c] sm:$0xf0]  ;;  %v489_v14 = vld [vmem:[#allocation2 + $0x24] sm:$0xf] }
   0xa   :  { %v447_v15 = vld [vmem:[#allocation2 + $0x30] sm:$0xf0]  ;;  %152 = vmatpush.bf16.msra.mxu1 %v466_v7  ;;  %v446_v16 = vor.u32 %v491_v13, %v445_v11  ;;  %v453_v18 = vld [vmem:[#allocation2 + $0x28] sm:$0xf]  ;;  %v492_v19 = vld [vmem:[#allocation2 + $0x34] sm:$0xf0] }
   0xb   :  { %171 = vmatpush.bf16.msra.mxu2 %v470_v8  ;;  %v450_v17 = vor.u32 %v489_v14, %v447_v15  ;;  %v490_v20 = vld [vmem:[#allocation2 + $0x2c] sm:$0xf]  ;;  %190 = vmatpush.bf16.msra.mxu3 %v474_v12  ;;  %v454_v21 = vor.u32 %v492_v19, %v453_v18  ;;  %v455_v22 = vld [vmem:[#allocation2 + $0x38] sm:$0xf0]  ;;  %v429_v23 = vld [vmem:[#allocation2] sm:$0xf] }
   0xc   :  { %v487_v24 = vld [vmem:[#allocation2 + $0xc] sm:$0xf0]  ;;  %v458_v25 = vor.u32 %v490_v20, %v455_v22  ;;  %v485_v26 = vld [vmem:[#allocation2 + $0x4] sm:$0xf]  ;;  %v431_v27 = vld [vmem:[#allocation2 + $0x10] sm:$0xf0] }
   0xd   :  { %v437_v28 = vld [vmem:[#allocation2 + $0x8] sm:$0xf]  ;;  %134 = vmatpush.bf16.msra.mxu0 %v446_v16  ;;  %v430_v29 = vor.u32 %v487_v24, %v429_v23  ;;  %v488_v30 = vld [vmem:[#allocation2 + $0x14] sm:$0xf0]  ;;  %v486_v31 = vld [vmem:[#allocation2 + $0xc] sm:$0xf]  ;;  %v434_v33 = vor.u32 %v485_v26, %v431_v27 }
   0xe   :  { %v439_v32 = vld [vmem:[#allocation2 + $0x18] sm:$0xf0]  ;;  %153 = vmatpush.bf16.msra.mxu1 %v450_v17  ;;  %v438_v34 = vor.u32 %v488_v30, %v437_v28  ;;  %v483_v36 = vld [vmem:[%s734_s1] sm:$0xff]  ;;  %vm121_vm0 = vcmask 392192   ;;  %v484_v37 = vld [vmem:[%s734_s1 + $0x8] sm:$0xff]  ;;  %v566_v30 = vmov 2048.0  }
   0xf   :  { %172 = vmatpush.bf16.msra.mxu2 %v454_v21  ;;  %191 = vmatpush.bf16.msra.mxu3 %v458_v25  ;;  %v442_v35 = vor.u32 %v486_v31, %v439_v32  ;;  %507 = vrcp.f32 %v566_v30  ;;  %s406_s30 = sshll.u32 %s737_s4, 4  ;;  %s569_s5 = smov 512   ;;  %s407_s30 = int_to_ptr.hbm [resolvable:$true] %s406_s30 }
  0x10   :  { %s570_s6 = smov 32  }
  0x11   :  { %135 = vmatpush.bf16.msra.mxu0 %v430_v29 }
  0x12   :  { %154 = vmatpush.bf16.msra.mxu1 %v434_v33 }
  0x13   :  { %173 = vmatpush.bf16.msra.mxu2 %v438_v34  ;;  %192 = vmatpush.bf16.msra.mxu3 %v442_v35 }
  0x14   :  { %475 = vmatmul.msk.bf16.vlgmr.msra.gmra.mxu0 %vm121_vm0, %v483_v36 }
  0x15   :  { %477 = vmatmul.msk.bf16.vlgmr.msra.gmra.mxu1 %vm121_vm0, %v483_v36  ;;  %v508_v32 = vpop.eup %507 }
  0x16   :  { %479 = vmatmul.msk.bf16.vlgmr.msra.gmra.mxu2 %vm121_vm0, %v483_v36  ;;  %481 = vmatmul.msk.bf16.vlgmr.msra.gmra.mxu3 %vm121_vm0, %v483_v36  ;;  %v267_v33 = vmul.f32 2048.0, %v508_v32  ;;  %vm271_vm1 = vweird.f32 %v508_v32 }
  0x18   :  { %v268_v35 = vsub.f32 1.0, %v267_v33 }
  0x24   :  { %476 = vmatmul.msk.bf16.gmra.mxu0 %vm121_vm0, %v484_v37 }
  0x25   :  { %478 = vmatmul.msk.bf16.gmra.mxu1 %vm121_vm0, %v484_v37 }
  0x26   :  { %480 = vmatmul.msk.bf16.gmra.mxu2 %vm121_vm0, %v484_v37  ;;  %482 = vmatmul.msk.bf16.gmra.mxu3 %vm121_vm0, %v484_v37  ;;  %v567_v37 = vmov 0  }
  0x27   :  { %505 = vset.pattern.permute.xlu2 %v567_v37  ;;  %506 = vset.pattern.permute.xlu0 %v567_v37 }
  0x91   :  { %v605_v38 = vpop.f32.mrf.mxu0 }
  0x92   :  { %v607_v39 = vpop.f32.mrf.mxu1  ;;  %v224_v40 = vmul.f32 %v605_v38, %v605_v38 }
  0x93   :  { %v225_v41 = vmul.f32 %v607_v39, %v607_v39  ;;  %v204_v42 = vadd.f32 %v607_v39, %v605_v38 }
  0x95   :  { %v240_v43 = vadd.f32 %v225_v41, %v224_v40  ;;  %v269_v41 = vmul.f32 %v508_v32, %v268_v35 }
  0x99   :  { %v615_v44 = vpop.f32.mrf.mxu2  ;;  %v619_v46 = vpop.f32.mrf.mxu3 }
  0x9a   :  { %v226_v45 = vmul.f32 %v615_v44, %v615_v44  ;;  %v621_v47 = vpop.f32.mrf.mxu0  ;;  %v205_v48 = vadd.f32 %v204_v42, %v615_v44  ;;  %v624_v49 = vpop.f32.mrf.mxu1  ;;  %v227_v50 = vmul.f32 %v619_v46, %v619_v46 }
  0x9b   :  { %v228_v53 = vmul.f32 %v621_v47, %v621_v47  ;;  %v229_v54 = vmul.f32 %v624_v49, %v624_v49  ;;  %v209_v56 = vadd.f32 %v624_v49, %v621_v47 }
  0x9c   :  { %v206_v51 = vadd.f32 %v205_v48, %v619_v46  ;;  %v241_v52 = vadd.f32 %v240_v43, %v226_v45  ;;  %v270_v43 = vadd.f32 %v508_v32, %v269_v41 }
  0x9d   :  { %v245_v62 = vadd.f32 %v229_v54, %v228_v53 }
  0x9e   :  { %207 = vadd.xlane.f32.xlu0 %v206_v51  ;;  %v242_v55 = vadd.f32 %v241_v52, %v227_v50  ;;  %v272_v52 = vsel %vm271_vm1, %v508_v32, %v270_v43 }
  0xa0   :  { %243 = vadd.xlane.f32.xlu1 %v242_v55 }
  0xa1   :  { %v635_v57 = vpop.f32.mrf.mxu2  ;;  %v639_v59 = vpop.f32.mrf.mxu3 }
  0xa2   :  { %v230_v58 = vmul.f32 %v635_v57, %v635_v57  ;;  %v641_v60 = vpop.f32.mrf.mxu0  ;;  %v210_v61 = vadd.f32 %v209_v56, %v635_v57  ;;  %v646_v0 = vpop.f32.mrf.mxu1  ;;  %v231_v3 = vmul.f32 %v639_v59, %v639_v59 }
  0xa3   :  { %v232_v63 = vmul.f32 %v641_v60, %v641_v60  ;;  %v233_v1 = vmul.f32 %v646_v0, %v646_v0  ;;  %v214_v5 = vadd.f32 %v646_v0, %v641_v60 }
  0xa4   :  { %v211_v2 = vadd.f32 %v210_v61, %v639_v59  ;;  %v246_v4 = vadd.f32 %v245_v62, %v230_v58 }
  0xa5   :  { %v250_v7 = vadd.f32 %v233_v1, %v232_v63 }
  0xa6   :  { %212 = vadd.xlane.f32.xlu0 %v211_v2  ;;  %v247_v6 = vadd.f32 %v246_v4, %v231_v3 }
  0xa8   :  { %248 = vadd.xlane.f32.xlu2 %v247_v6 }
  0xa9   :  { %v655_v8 = vpop.f32.mrf.mxu2  ;;  %v659_v10 = vpop.f32.mrf.mxu3 }
  0xaa   :  { %v234_v9 = vmul.f32 %v655_v8, %v655_v8  ;;  %v215_v11 = vadd.f32 %v214_v5, %v655_v8  ;;  %v662_v12 = vpop.f32.mrf.mxu0  ;;  %v664_v13 = vpop.f32.mrf.mxu1  ;;  %v235_v14 = vmul.f32 %v659_v10, %v659_v10 }
  0xab   :  { %v236_v17 = vmul.f32 %v662_v12, %v662_v12  ;;  %v237_v18 = vmul.f32 %v664_v13, %v664_v13  ;;  %v219_v20 = vadd.f32 %v664_v13, %v662_v12 }
  0xac   :  { %v216_v15 = vadd.f32 %v215_v11, %v659_v10  ;;  %v251_v16 = vadd.f32 %v250_v7, %v234_v9 }
  0xad   :  { %v255_v22 = vadd.f32 %v237_v18, %v236_v17  ;;  %v291_v17 = vld [vmem:[%s736_s3] sm:$0xff] }
  0xae   :  { %217 = vadd.xlane.f32.xlu1 %v216_v15  ;;  %v252_v19 = vadd.f32 %v251_v16, %v235_v14  ;;  %v289_v14 = vld [vmem:[%s735_s2] sm:$0xff]  ;;  %s568_s2 = smov [#allocation5]  }
  0xaf   :  { %s404_s3 = sshll.u32 %s568_s2, 4  ;;  %s405_s3 = int_to_ptr.vmem [resolvable:$true] %s404_s3 }
  0xb0   :  { %253 = vadd.xlane.f32.xlu0 %v252_v19 }
  0xb1   :  { %v675_v21 = vpop.f32.mrf.mxu2  ;;  %v680_v25 = vpop.f32.mrf.mxu3 }
  0xb2   :  { %v220_v23 = vadd.f32 %v219_v20, %v675_v21  ;;  %v238_v24 = vmul.f32 %v675_v21, %v675_v21  ;;  %v239_v26 = vmul.f32 %v680_v25, %v680_v25 }
  0xb4   :  { %v221_v27 = vadd.f32 %v220_v23, %v680_v25  ;;  %v256_v28 = vadd.f32 %v255_v22, %v238_v24 }
  0xb6   :  { %222 = vadd.xlane.f32.xlu2 %v221_v27  ;;  %v257_v29 = vadd.f32 %v256_v28, %v239_v26 }
  0xb8   :  { %258 = vadd.xlane.f32.xlu1 %v257_v29 }
 0x111   :  { %v208_v31 = vpop.xlane.xlu0 %207 }
 0x113   :  { %v244_v34 = vpop.xlane.xlu1 %243 }
 0x119   :  { %v213_v36 = vpop.xlane.xlu0 %212 }
 0x11a   :  { %v260_v45 = vadd.f32 %v213_v36, %v208_v31 }
 0x11b   :  { %v249_v40 = vpop.xlane.xlu2 %248 }
 0x11c   :  { %v263_v50 = vadd.f32 %v249_v40, %v244_v34 }
 0x121   :  { %v218_v42 = vpop.xlane.xlu1 %217 }
 0x122   :  { %v261_v51 = vadd.f32 %v260_v45, %v218_v42 }
 0x123   :  { %v254_v48 = vpop.xlane.xlu0 %253 }
 0x124   :  { %v264_v54 = vadd.f32 %v263_v50, %v254_v48 }
 0x129   :  { %v223_v53 = vpop.xlane.xlu2 %222 }
 0x12a   :  { %v262_v55 = vadd.f32 %v261_v51, %v223_v53 }
 0x12b   :  { %v259_v56 = vpop.xlane.xlu1 %258 }
 0x12c   :  { %v273_v58 = vmul.f32 %v272_v52, %v262_v55  ;;  %v265_v61 = vadd.f32 %v264_v54, %v259_v56 }
 0x12e   :  { %v275_v62 = vmul.f32 %v273_v58, %v273_v58  ;;  %v274_v63 = vmul.f32 %v272_v52, %v265_v61 }
 0x130   :  { %v276_v1 = vsub.f32 %v274_v63, %v275_v62 }
 0x132   :  { %v277_v2 = vmax.f32 %v276_v1, 0.0 }
 0x134   :  { %v278_v3 = vadd.f32 1e-05, %v277_v2 }
 0x136   :  { %509 = vrsqrt.f32 %v278_v3  ;;  %vm285_vm3 = vweird.f32 %v278_v3 }
 0x13c   :  { %v510_v4 = vpop.eup %509 }
 0x13d   :  { %v280_v5 = vmul.f32 %v510_v4, %v278_v3  ;;  %vm286_vm2 = vweird.f32 %v510_v4 }
 0x13e   :  { %vm287_vm4 = vmor %vm285_vm3, %vm286_vm2 }
 0x13f   :  { %v281_v6 = vmul.f32 %v510_v4, %v280_v5 }
 0x141   :  { %v282_v7 = vmul.f32 0.5, %v281_v6 }
 0x143   :  { %v283_v9 = vsub.f32 1.5, %v282_v7 }
 0x145   :  { %v284_v11 = vmul.f32 %v510_v4, %v283_v9 }
 0x147   :  { %v288_v15 = vsel %vm287_vm4, %v510_v4, %v284_v11 }
 0x148   :  { %v290_v16 = vmul.f32 %v289_v14, %v288_v15 }
 0x14a   :  { %296 = vperm.xlu2 %505, %v290_v16   ;;  %v292_v18 = vmul.f32 %v290_v16, %v273_v58 }
 0x14c   :  { %v293_v19 = vsub.f32 %v291_v17, %v292_v18 }
 0x14e   :  { %317 = vperm.xlu0 %506, %v293_v19  }
 0x1a4   :  { %v297_v20 = vpop.permute.xlu2 %296 }
 0x1a5   :  { %v299_v23 = vmul.f32 %v297_v20, %v605_v38  ;;  %v300_v24 = vmul.f32 %v297_v20, %v607_v39  ;;  %v301_v26 = vmul.f32 %v297_v20, %v615_v44  ;;  %v302_v27 = vmul.f32 %v297_v20, %v619_v46 }
 0x1a6   :  { %v303_v28 = vmul.f32 %v297_v20, %v621_v47  ;;  %v304_v31 = vmul.f32 %v297_v20, %v624_v49  ;;  %v305_v32 = vmul.f32 %v297_v20, %v635_v57  ;;  %v306_v33 = vmul.f32 %v297_v20, %v639_v59 }
 0x1a7   :  { %v307_v39 = vmul.f32 %v297_v20, %v641_v60  ;;  %v308_v44 = vmul.f32 %v297_v20, %v646_v0  ;;  %v309_v46 = vmul.f32 %v297_v20, %v655_v8  ;;  %v310_v34 = vmul.f32 %v297_v20, %v659_v10 }
 0x1a8   :  { %v311_v35 = vmul.f32 %v297_v20, %v662_v12  ;;  %v312_v49 = vmul.f32 %v297_v20, %v664_v13  ;;  %v313_v59 = vmul.f32 %v297_v20, %v675_v21  ;;  %v314_v40 = vmul.f32 %v297_v20, %v680_v25 }
 0x1c0   :  { %v691_v22 = vpop.permute.xlu0 %317 }
 0x1c1   :  { %v320_v29 = vadd.f32 %v691_v22, %v299_v23  ;;  %v321_v30 = vadd.f32 %v691_v22, %v300_v24  ;;  %v322_v38 = vadd.f32 %v691_v22, %v301_v26  ;;  %v323_v47 = vadd.f32 %v691_v22, %v302_v27 }
 0x1c2   :  { %v324_v57 = vadd.f32 %v691_v22, %v303_v28  ;;  %v325_v36 = vadd.f32 %v691_v22, %v304_v31  ;;  %v326_v60 = vadd.f32 %v691_v22, %v305_v32  ;;  %v327_v10 = vadd.f32 %v691_v22, %v306_v33 }
 0x1c3   :  { %vm336_vm5 = vcmp.gt.f32.partialorder %v320_v29, 0.0  ;;  %vm337_vm6 = vcmp.gt.f32.partialorder %v321_v30, 0.0  ;;  %v352_v0 = vmul.f32 0.2, %v320_v29  ;;  %v353_v8 = vmul.f32 0.2, %v321_v30 }
 0x1c4   :  { %v354_v37 = vmul.f32 0.2, %v322_v38  ;;  %vm338_vm7 = vcmp.gt.f32.partialorder %v322_v38, 0.0  ;;  %v355_v12 = vmul.f32 0.2, %v323_v47  ;;  %v328_v13 = vadd.f32 %v691_v22, %v307_v39 }
 0x1c5   :  { %vm339_vm8 = vcmp.gt.f32.partialorder %v323_v47, 0.0  ;;  %v356_v41 = vmul.f32 0.2, %v324_v57  ;;  %v368_v21 = vsel %vm336_vm5, %v320_v29, %v352_v0  ;;  %v329_v42 = vadd.f32 %v691_v22, %v308_v44 }
 0x1c6   :  { %vm340_vm9 = vcmp.gt.f32.partialorder %v324_v57, 0.0  ;;  %v357_v43 = vmul.f32 0.2, %v325_v36  ;;  %v369_v45 = vsel %vm337_vm6, %v321_v30, %v353_v8  ;;  %v330_v48 = vadd.f32 %v691_v22, %v309_v46  ;;  %384 = vst [vmem:[#allocation5] sm:$0xff] %v368_v21 }
 0x1c7   :  { %vm341_vm10 = vcmp.gt.f32.partialorder %v325_v36, 0.0  ;;  %v358_v50 = vmul.f32 0.2, %v326_v60  ;;  %v370_v25 = vsel %vm338_vm7, %v322_v38, %v354_v37  ;;  %v331_v51 = vadd.f32 %v691_v22, %v310_v34  ;;  %385 = vst [vmem:[#allocation5 + $0x8] sm:$0xff] %v369_v45 }
 0x1c8   :  { %vm342_vm11 = vcmp.gt.f32.partialorder %v326_v60, 0.0  ;;  %v359_v52 = vmul.f32 0.2, %v327_v10  ;;  %v371_v53 = vsel %vm339_vm8, %v323_v47, %v355_v12  ;;  %v332_v54 = vadd.f32 %v691_v22, %v311_v35  ;;  %386 = vst [vmem:[#allocation5 + $0x10] sm:$0xff] %v370_v25 }
 0x1c9   :  { %vm343_vm12 = vcmp.gt.f32.partialorder %v327_v10, 0.0  ;;  %v360_v55 = vmul.f32 0.2, %v328_v13  ;;  %v372_v56 = vsel %vm340_vm9, %v324_v57, %v356_v41  ;;  %v333_v58 = vadd.f32 %v691_v22, %v312_v49  ;;  %387 = vst [vmem:[#allocation5 + $0x18] sm:$0xff] %v371_v53 }
 0x1ca   :  { %vm344_vm13 = vcmp.gt.f32.partialorder %v328_v13, 0.0  ;;  %v361_v61 = vmul.f32 0.2, %v329_v42  ;;  %v373_v62 = vsel %vm341_vm10, %v325_v36, %v357_v43  ;;  %v334_v63 = vadd.f32 %v691_v22, %v313_v59  ;;  %388 = vst [vmem:[#allocation5 + $0x20] sm:$0xff] %v372_v56 }
 0x1cb   :  { %vm345_vm14 = vcmp.gt.f32.partialorder %v329_v42, 0.0  ;;  %v362_v1 = vmul.f32 0.2, %v330_v48  ;;  %v374_v2 = vsel %vm342_vm11, %v326_v60, %v358_v50  ;;  %v335_v3 = vadd.f32 %v691_v22, %v314_v40  ;;  %389 = vst [vmem:[#allocation5 + $0x28] sm:$0xff] %v373_v62 }
 0x1cc   :  { %vm346_vm15 = vcmp.gt.f32.partialorder %v330_v48, 0.0  ;;  %v363_v4 = vmul.f32 0.2, %v331_v51  ;;  %v375_v5 = vsel %vm343_vm12, %v327_v10, %v359_v52  ;;  %vm347_vm0 = vcmp.gt.f32.partialorder %v331_v51, 0.0  ;;  %390 = vst [vmem:[#allocation5 + $0x30] sm:$0xff] %v374_v2 }
 0x1cd   :  { %v364_v6 = vmul.f32 0.2, %v332_v54  ;;  %v376_v7 = vsel %vm344_vm13, %v328_v13, %v360_v55  ;;  %vm348_vm1 = vcmp.gt.f32.partialorder %v332_v54, 0.0  ;;  %v365_v9 = vmul.f32 0.2, %v333_v58  ;;  %391 = vst [vmem:[#allocation5 + $0x38] sm:$0xff] %v375_v5 }
 0x1ce   :  { %v377_v11 = vsel %vm345_vm14, %v329_v42, %v361_v61  ;;  %vm349_vm2 = vcmp.gt.f32.partialorder %v333_v58, 0.0  ;;  %v366_v14 = vmul.f32 0.2, %v334_v63  ;;  %v378_v15 = vsel %vm346_vm15, %v330_v48, %v362_v1  ;;  %392 = vst [vmem:[#allocation5 + $0x40] sm:$0xff] %v376_v7 }
 0x1cf   :  { %vm350_vm3 = vcmp.gt.f32.partialorder %v334_v63, 0.0  ;;  %v367_v16 = vmul.f32 0.2, %v335_v3  ;;  %v379_v17 = vsel %vm347_vm0, %v331_v51, %v363_v4  ;;  %vm351_vm4 = vcmp.gt.f32.partialorder %v335_v3, 0.0  ;;  %393 = vst [vmem:[#allocation5 + $0x48] sm:$0xff] %v377_v11 }
 0x1d0   :  { %v380_v18 = vsel %vm348_vm1, %v332_v54, %v364_v6  ;;  %v381_v19 = vsel %vm349_vm2, %v333_v58, %v365_v9  ;;  %394 = vst [vmem:[#allocation5 + $0x50] sm:$0xff] %v378_v15  ;;  %v382_v20 = vsel %vm350_vm3, %v334_v63, %v366_v14 }
 0x1d1   :  { %395 = vst [vmem:[#allocation5 + $0x58] sm:$0xff] %v379_v17  ;;  %v383_v22 = vsel %vm351_vm4, %v335_v3, %v367_v16 }
 0x1d2   :  { %396 = vst [vmem:[#allocation5 + $0x60] sm:$0xff] %v380_v18 }
 0x1d3   :  { %397 = vst [vmem:[#allocation5 + $0x68] sm:$0xff] %v381_v19 }
 0x1d4   :  { %398 = vst [vmem:[#allocation5 + $0x70] sm:$0xff] %v382_v20 }
 0x1d5   :  { %399 = vst [vmem:[#allocation5 + $0x78] sm:$0xff] %v383_v22 }
 0x1d6   :  { %412 = dma.vmem_to_hbm [thread:$0]  %s405_s3, 2048, %s407_s30, [#allocation4], %s569_s5, %s569_s5, %s570_s6  }
 0x1d7   :  { %561 = dma.done.wait [#allocation4], 2048  }
 0x1d8   :  { %562 = vsyncadd [#allocation4], 4294965248 }
 0x1d9   :  { %417 = vsyncpa [#allocation3], 1 }
 0x1da   :  { %418 = vsyncpa [#allocation4], 1 }

</bundles_post_ra>
